<compile_context>
chip_gen: v7x
topology: tpu7x:2x2x1
jax: 0.10.0
libtpu: 0.0.40
codegen_flags: <defaults>
</compile_context>

<pallas_src>
import numpy as np
import jax
import jax.numpy as jnp
from jax import lax
from jax.experimental import pallas as pl
from jax.experimental.pallas import tpu as pltpu


def make_interp_matrix(out_size: int, in_size: int) -> np.ndarray:
    """Row-stochastic matrix W s.t. (W @ v) == F.interpolate(v, align_corners=False)."""
    scale = in_size / out_size
    j = np.arange(out_size)
    src = np.maximum((j + 0.5) * scale - 0.5, 0.0)   # PyTorch clamps negative src to 0
    i0 = np.minimum(np.floor(src).astype(np.int64), in_size - 1)
    frac = src - i0
    i1 = np.minimum(i0 + 1, in_size - 1)
    W = np.zeros((out_size, in_size), dtype=np.float32)
    W[j, i0] += (1.0 - frac).astype(np.float32)
    W[j, i1] += frac.astype(np.float32)
    return W


def build_fused_operator(weight, Hin, Win, Hout, Wout):
    """Fold interp-H x interp-W x 3x3 SAME conv into one (C*Hin*Win, C*Hout*Wout) matrix.

    out[n, co, ho, wo] = sum_{ci,hi,wi} Op[(ci,hi,wi),(co,ho,wo)] * x[n, ci, hi, wi]
    with
      Op = sum_{kh,kw} weight[co,ci,kh,kw] * WhP[ho+kh, hi] * WwP[wo+kw, wi]
    where WhP / WwP are the zero-padded bilinear interpolation matrices (the
    zero rows top/bottom/left/right reproduce the conv's SAME padding).
    """
    C = weight.shape[0]
    Hp, Wp = Hout + 2, Wout + 2

    whp = np.zeros((Hp, Hin), dtype=np.float32)
    whp[1:-1, :] = make_interp_matrix(Hout, Hin)
    wwp = np.zeros((Wp, Win), dtype=np.float32)
    wwp[1:-1, :] = make_interp_matrix(Wout, Win)

    # Tap-shifted interp matrices: Ah[kh][ho, hi] = WhP[ho+kh, hi], etc.
    ah = np.stack([whp[kh:kh + Hout, :] for kh in range(3)])   # (3, Hout, Hin)
    aw = np.stack([wwp[kw:kw + Wout, :] for kw in range(3)])   # (3, Wout, Win)

    # indices: o=co, i=ci, u=kh, v=kw, h=ho, w=wo, p=hi, q=wi
    op = jnp.einsum('oiuv,uhp,vwq->ipqohw',
                    weight.astype(jnp.float32),
                    jnp.asarray(ah), jnp.asarray(aw))          # (ci,hi,wi,co,ho,wo)
    return op.reshape(C * Hin * Win, C * Hout * Wout)


def conv_upsampling_kernel(x_ref, op_ref, b_ref, o_ref):
    # x_ref:  (N, C*Hin*Win)        VMEM  (flattened NCHW input)
    # op_ref: (C*Hin*Win, C*HW)     VMEM  (fused interp+conv operator)
    # b_ref:  (1, C*HW)             VMEM  (bias pre-broadcast over spatial)
    # o_ref:  (N, C*HW)             VMEM  (lane-dense output, minor dim multiple of 128)
    acc = jnp.dot(x_ref[...], op_ref[...], preferred_element_type=jnp.float32)
    o_ref[...] = (acc + b_ref[...]).astype(o_ref.dtype)


def conv_upsampling(x, weight, bias, size):
    """x: (N, C, Hin, Win) f32; weight: (C, C, 3, 3); bias: (C,); size: (Hout, Wout)."""
    N, C, Hin, Win = x.shape
    Hout, Wout = size
    HW = Hout * Wout
    K = C * Hin * Win        # contraction dim (256 at the test shapes)
    M = C * HW               # output lane dim (1024 at the test shapes)

    op = build_fused_operator(weight, Hin, Win, Hout, Wout)            # (K, M)
    b_flat = jnp.broadcast_to(bias.astype(jnp.float32)[:, None],
                              (C, HW)).reshape(1, M)                   # (1, M)
    x_flat = x.astype(jnp.float32).reshape(N, K)                       # (N, K)

    grid_spec = pltpu.PrefetchScalarGridSpec(
        num_scalar_prefetch=0,
        grid=(1,),
        in_specs=[
            pl.BlockSpec((N, K), lambda i: (0, 0)),
            pl.BlockSpec((K, M), lambda i: (0, 0)),
            pl.BlockSpec((1, M), lambda i: (0, 0)),
        ],
        out_specs=pl.BlockSpec((N, M), lambda i: (0, 0)),
    )

    out_flat = pl.pallas_call(
        conv_upsampling_kernel,
        out_shape=jax.ShapeDtypeStruct((N, M), jnp.float32),
        grid_spec=grid_spec,
        compiler_params=pltpu.CompilerParams(
            dimension_semantics=("arbitrary",)),
    )(x_flat, op, b_flat)

    return out_flat.reshape(N, C, Hout, Wout)


def reference_forward(x, weight, bias, wh_core, ww_core):
    """Pure-JAX reference: same separable bilinear + lax conv (NCHW)."""
    y = jnp.einsum('hi,nciw->nchw', wh_core, x)
    y = jnp.einsum('nchw,vw->nchv', y, ww_core)
    out = lax.conv_general_dilated(
        y, weight, window_strides=(1, 1), padding='SAME',
        dimension_numbers=('NCHW', 'OIHW', 'NCHW'))
    return out + bias[None, :, None, None]


if __name__ == "__main__":
    key = jax.random.PRNGKey(0)
    kx, kw, kb = jax.random.split(key, 3)

    N, C, Hin, Win = 2, 4, 8, 8
    size = (16, 16)

    x = jax.random.normal(kx, (N, C, Hin, Win), dtype=jnp.float32)
    # Deterministic synthetic conv params (shapes from nn.Conv2d(C, C, 3, padding=1)).
    fan_in = C * 3 * 3
    bound = 1.0 / np.sqrt(fan_in)
    weight = jax.random.uniform(kw, (C, C, 3, 3), jnp.float32, -bound, bound)
    bias = jax.random.uniform(kb, (C,), jnp.float32, -bound, bound)

    out = conv_upsampling(x, weight, bias, size)
    out = jax.block_until_ready(out)

    wh_core = jnp.asarray(make_interp_matrix(size[0], Hin))
    ww_core = jnp.asarray(make_interp_matrix(size[1], Win))
    ref = reference_forward(x, weight, bias, wh_core, ww_core)
    assert out.shape == (N, C, size[0], size[1])
    np.testing.assert_allclose(np.asarray(out), np.asarray(ref), rtol=5e-4, atol=5e-4)

    print("KERNEL_OK")
</pallas_src>

<mosaic_0001>
module attributes {stable_mosaic.version = 11 : i64} {
  func.func @conv_upsampling_kernel(%arg0: i32, %arg1: memref<2x256xf32, #tpu.memory_space<vmem>>, %arg2: memref<256x1024xf32, #tpu.memory_space<vmem>>, %arg3: memref<1x1024xf32, #tpu.memory_space<vmem>>, %arg4: memref<2x1024xf32, #tpu.memory_space<vmem>>) attributes {dimension_semantics = [#tpu.dimension_semantics<arbitrary>], iteration_bounds = array<i64: 1>, scalar_prefetch = 0 : i64, scratch_operands = 0 : i64, tpu.core_type = #tpu.core_type<tc>, window_params = [{pipeline_mode = #tpu.pipeline_mode<synchronous>, transform_indices = @transform_0, window_bounds = array<i64: 2, 256>}, {pipeline_mode = #tpu.pipeline_mode<synchronous>, transform_indices = @transform_1, window_bounds = array<i64: 256, 1024>}, {pipeline_mode = #tpu.pipeline_mode<synchronous>, transform_indices = @transform_2, window_bounds = array<i64: 1, 1024>}, {pipeline_mode = #tpu.pipeline_mode<synchronous>, transform_indices = @transform_3, window_bounds = array<i64: 2, 1024>}]} {
    %c0 = arith.constant 0 : index
    %c0_0 = arith.constant 0 : index
    %0 = vector.load %arg1[%c0, %c0_0] : memref<2x256xf32, #tpu.memory_space<vmem>>, vector<2x256xf32>
    %c0_1 = arith.constant 0 : index
    %c0_2 = arith.constant 0 : index
    %1 = vector.load %arg2[%c0_1, %c0_2] : memref<256x1024xf32, #tpu.memory_space<vmem>>, vector<256x1024xf32>
    %cst = arith.constant dense<0.000000e+00> : vector<2x1024xf32>
    %2 = tpu.matmul %0, %1, %cst {dimension_numbers = #tpu.dot_dimension_numbers<[1], [0], [0], [1], [0, 0, 1, 1], [], []>} : vector<2x256xf32>, vector<256x1024xf32>, vector<2x1024xf32> -> vector<2x1024xf32>
    %c0_3 = arith.constant 0 : index
    %c0_4 = arith.constant 0 : index
    %3 = vector.load %arg3[%c0_3, %c0_4] : memref<1x1024xf32, #tpu.memory_space<vmem>>, vector<1x1024xf32>
    %4 = vector.broadcast %3 : vector<1x1024xf32> to vector<2x1024xf32>
    %5 = arith.addf %2, %4 : vector<2x1024xf32>
    %c0_5 = arith.constant 0 : index
    %c0_6 = arith.constant 0 : index
    %6 = vector.load %arg4[%c0_5, %c0_6] : memref<2x1024xf32, #tpu.memory_space<vmem>>, vector<2x1024xf32>
    tpu.vector_store %arg4[%c0_5, %c0_6], %5 {strides = array<i32>} : memref<2x1024xf32, #tpu.memory_space<vmem>>, vector<2x1024xf32>,
    return
  }
  func.func @transform_0(%arg0: i32) -> (i32, i32) {
    %c0_i32 = arith.constant 0 : i32
    %c0_i32_0 = arith.constant 0 : i32
    %c0_i32_1 = arith.constant 0 : i32
    return %c0_i32, %c0_i32_0 : i32, i32
  }
  func.func @transform_1(%arg0: i32) -> (i32, i32) {
    %c0_i32 = arith.constant 0 : i32
    %c0_i32_0 = arith.constant 0 : i32
    %c0_i32_1 = arith.constant 0 : i32
    return %c0_i32, %c0_i32_0 : i32, i32
  }
  func.func @transform_2(%arg0: i32) -> (i32, i32) {
    %c0_i32 = arith.constant 0 : i32
    %c0_i32_0 = arith.constant 0 : i32
    %c0_i32_1 = arith.constant 0 : i32
    return %c0_i32, %c0_i32_0 : i32, i32
  }
  func.func @transform_3(%arg0: i32) -> (i32, i32) {
    %c0_i32 = arith.constant 0 : i32
    %c0_i32_0 = arith.constant 0 : i32
    %c0_i32_1 = arith.constant 0 : i32
    return %c0_i32, %c0_i32_0 : i32, i32
  }
}

</mosaic_0001>

<bundles_post_ra>
// kernel: tpu_custom_call.1
= control target key start
LH: loop header
LB: loop body
LE: loop exit
PB: predicated region body
PF: predicated region fallthrough
CT: control target
= control target key end

     0   :  { %8 = vsyncpa [#allocation3], 0  ;;  %s1155_s0 = inlined_call_operand.hbm [shape: f32[2,256], index: 0, kind: input, shape index: {}]   ;;  %s1156_s1 = inlined_call_operand.hbm [shape: f32[256,1024], index: 1, kind: input, shape index: {}]   ;;  %s1157_s2 = inlined_call_operand.hbm [shape: f32[1,1024], index: 2, kind: input, shape index: {}]   ;;  %s1158_s3 = inlined_call_operand.hbm [shape: f32[2,1024], index: 3, kind: output, shape index: {}]  }
   0x1   :  { %9 = vsyncpa [#allocation6], 0 }
   0x2   :  { %10 = vsyncpa [#allocation4], 0  ;;  %s1066_s12 = smov [#allocation5]   ;;  %s972_s16 = scalar_lea.hbm %s1156_s1, 32768 }
   0x3   :  { %s26_s13 = sshll.u32 %s1066_s12, 4  ;;  %p973_p0 = scmp.ne.s32.totalorder %s1156_s1, %s972_s16  ;;  %s27_s13 = int_to_ptr.vmem [resolvable:$true] %s26_s13 }
   0x4   :  { %p976_p1 = scmp.lt.u32.totalorder %s972_s16, %s1156_s1 }
   0x6   :  { %p978_p2 = pnand %p976_p1, %p973_p0 }
   0x8   :  { %981 = shalt.err (!%p978_p2)
}
   0x9   :  { %s982_s21 = scalar_lea.vmem %s27_s13, 32768  ;;  %p987_p4 = scmp.lt.s32.totalorder %s27_s13, %s27_s13 }
   0xa   :  { %p983_p3 = scmp.ne.s32.totalorder %s27_s13, %s982_s21  ;;  %p988_p5 = scmp.lt.s32.totalorder %s982_s21, %s982_s21 }
   0xc   :  { %p989_p6 = por %p988_p5, %p987_p4 }
   0xe   :  { %p990_p7 = pnand %p989_p6, %p983_p3 }
  0x10   :  { %993 = shalt.err (!%p990_p7)
}
  0x11   :  { %s1067_s22 = smov 1024   ;;  %s1068_s23 = smov 64  }
  0x12   :  { %32 = dma.hbm_to_vmem [thread:$0]  %s1156_s1, 32768, %s27_s13, [#allocation6], %s1067_s22, %s1067_s22, %s1068_s23  }
  0x13   :  { %s1069_s26 = smov [#allocation2]   ;;  %s1070_s28 = smov [#allocation7]  }
  0x14   :  { %s17_s27 = sshll.u32 %s1069_s26, 4  ;;  %s39_s29 = sshll.u32 %s1070_s28, 4  ;;  %s18_s27 = int_to_ptr.vmem [resolvable:$true] %s17_s27  ;;  %s40_s29 = int_to_ptr.vmem [resolvable:$true] %s39_s29 }
  0x15   :  { %s994_s5 = scalar_lea.hbm %s1155_s0, 64 }
  0x16   :  { %p995_p8 = scmp.ne.s32.totalorder %s1155_s0, %s994_s5  ;;  %p998_p9 = scmp.lt.u32.totalorder %s994_s5, %s1155_s0 }
  0x18   :  { %p1000_p10 = pnand %p998_p9, %p995_p8 }
  0x1a   :  { %1003 = shalt.err (!%p1000_p10)
}
  0x1b   :  { %s1004_s1 = scalar_lea.vmem %s18_s27, 64  ;;  %p1009_p12 = scmp.lt.s32.totalorder %s18_s27, %s18_s27 }
  0x1c   :  { %p1005_p11 = scmp.ne.s32.totalorder %s18_s27, %s1004_s1  ;;  %p1010_p13 = scmp.lt.s32.totalorder %s1004_s1, %s1004_s1 }
  0x1e   :  { %p1011_p0 = por %p1010_p13, %p1009_p12 }
  0x20   :  { %p1012_p1 = pnand %p1011_p0, %p1005_p11 }
  0x22   :  { %1015 = shalt.err (!%p1012_p1)
}
  0x23   :  { %20 = dma.hbm_to_vmem [thread:$0]  %s1155_s0, 64, %s18_s27, [#allocation3]  }
  0x24   :  { %s1016_s14 = scalar_lea.hbm %s1157_s2, 128 }
  0x25   :  { %p1017_p2 = scmp.ne.s32.totalorder %s1157_s2, %s1016_s14  ;;  %p1020_p3 = scmp.lt.u32.totalorder %s1016_s14, %s1157_s2 }
  0x27   :  { %p1022_p4 = pnand %p1020_p3, %p1017_p2 }
  0x29   :  { %1025 = shalt.err (!%p1022_p4)
}
  0x2a   :  { %s1026_s19 = scalar_lea.vmem %s40_s29, 128  ;;  %p1031_p6 = scmp.lt.s32.totalorder %s40_s29, %s40_s29 }
  0x2b   :  { %p1027_p5 = scmp.ne.s32.totalorder %s40_s29, %s1026_s19  ;;  %p1032_p7 = scmp.lt.s32.totalorder %s1026_s19, %s1026_s19 }
  0x2d   :  { %p1033_p8 = por %p1032_p7, %p1031_p6 }
  0x2f   :  { %p1034_p9 = pnand %p1033_p8, %p1027_p5 }
  0x31   :  { %1037 = shalt.err (!%p1034_p9)
}
  0x32   :  { %42 = dma.hbm_to_vmem [thread:$0]  %s1157_s2, 128, %s40_s29, [#allocation6]  }
  0x33   :  { %1060 = dma.done.wait [#allocation3], 64  }
  0x34   :  { %1061 = vsyncadd [#allocation3], 4294967232 }
  0x35   :  { %1062 = dma.done.wait [#allocation6], 32896  }
  0x36   :  { %1063 = vsyncadd [#allocation6], 4294934400  ;;  %v54_v0 = vld [vmem:[#allocation5 + $0x8] sm:$0xff]  ;;  %v56_v2 = vld [vmem:[#allocation5 + $0x18] sm:$0xff]  ;;  %s1072_s2 = smov [#allocation8]  }
  0x37   :  { %v62_v1 = vld [vmem:[#allocation5 + $0x48] sm:$0xff]  ;;  %v64_v4 = vld [vmem:[#allocation5 + $0x58] sm:$0xff]  ;;  %v53_v5 = vld [vmem:[#allocation5] sm:$0xff]  ;;  %s698_s21 = sshll.u32 %s1072_s2, 4  ;;  %s699_s21 = int_to_ptr.vmem [resolvable:$true] %s698_s21 }
  0x38   :  { %v709_v3 = vpack.c.bf16 %v62_v1, %v54_v0  ;;  %v61_v6 = vld [vmem:[#allocation5 + $0x40] sm:$0xff]  ;;  %v773_v7 = vpack.c.bf16 %v64_v4, %v56_v2  ;;  %v55_v9 = vld [vmem:[#allocation5 + $0x10] sm:$0xff]  ;;  %v70_v11 = vld [vmem:[#allocation5 + $0x88] sm:$0xff]  ;;  %s1038_s22 = scalar_lea.vmem %s699_s21, 256  ;;  %p1043_p11 = scmp.lt.s32.totalorder %s699_s21, %s699_s21 }
  0x39   :  { %v711_v8 = vpack.c.bf16 %v61_v6, %v53_v5  ;;  %v63_v10 = vld [vmem:[#allocation5 + $0x50] sm:$0xff]  ;;  %v78_v13 = vld [vmem:[#allocation5 + $0xc8] sm:$0xff]  ;;  %v72_v14 = vld [vmem:[#allocation5 + $0x98] sm:$0xff]  ;;  %p1039_p10 = scmp.ne.s32.totalorder %s699_s21, %s1038_s22  ;;  %p1044_p12 = scmp.lt.s32.totalorder %s1038_s22, %s1038_s22 }
  0x3a   :  { %710 = vmatprep.subr.bf16.mxu0 %v709_v3  ;;  %v775_v12 = vpack.c.bf16 %v63_v10, %v55_v9  ;;  %v80_v15 = vld [vmem:[#allocation5 + $0xd8] sm:$0xff]  ;;  %774 = vmatprep.subr.bf16.mxu1 %v773_v7  ;;  %v713_v16 = vpack.c.bf16 %v78_v13, %v70_v11  ;;  %v69_v18 = vld [vmem:[#allocation5 + $0x80] sm:$0xff]  ;;  %v71_v20 = vld [vmem:[#allocation5 + $0x90] sm:$0xff] }
  0x3b   :  { %712 = vmatpush1.bf16.msra.mxu0 %v711_v8  ;;  %v777_v17 = vpack.c.bf16 %v80_v15, %v72_v14  ;;  %v77_v19 = vld [vmem:[#allocation5 + $0xc0] sm:$0xff]  ;;  %v79_v22 = vld [vmem:[#allocation5 + $0xd0] sm:$0xff]  ;;  %v86_v23 = vld [vmem:[#allocation5 + $0x108] sm:$0xff]  ;;  %p1045_p13 = por %p1044_p12, %p1043_p11 }
  0x3c   :  { %776 = vmatpush1.bf16.msra.mxu1 %v775_v12  ;;  %v715_v21 = vpack.c.bf16 %v77_v19, %v69_v18  ;;  %v94_v24 = vld [vmem:[#allocation5 + $0x148] sm:$0xff]  ;;  %714 = vmatprep.subr.bf16.mxu0 %v713_v16  ;;  %v779_v25 = vpack.c.bf16 %v79_v22, %v71_v20  ;;  %v88_v27 = vld [vmem:[#allocation5 + $0x118] sm:$0xff]  ;;  %v85_v29 = vld [vmem:[#allocation5 + $0x100] sm:$0xff] }
  0x3d   :  { %778 = vmatprep.subr.bf16.mxu1 %v777_v17  ;;  %v717_v26 = vpack.c.bf16 %v94_v24, %v86_v23  ;;  %v96_v28 = vld [vmem:[#allocation5 + $0x158] sm:$0xff]  ;;  %v93_v31 = vld [vmem:[#allocation5 + $0x140] sm:$0xff]  ;;  %v87_v32 = vld [vmem:[#allocation5 + $0x110] sm:$0xff]  ;;  %p1046_p0 = pnand %p1045_p13, %p1039_p10 }
  0x3e   :  { %v781_v30 = vpack.c.bf16 %v96_v28, %v88_v27  ;;  %v95_v33 = vld [vmem:[#allocation5 + $0x150] sm:$0xff]  ;;  %v719_v34 = vpack.c.bf16 %v93_v31, %v85_v29  ;;  %v102_v35 = vld [vmem:[#allocation5 + $0x188] sm:$0xff]  ;;  %v104_v37 = vld [vmem:[#allocation5 + $0x198] sm:$0xff] }
  0x3f   :  { %716 = vmatpush1.bf16.msra.mxu0 %v715_v21  ;;  %v110_v36 = vld [vmem:[#allocation5 + $0x1c8] sm:$0xff]  ;;  %v783_v38 = vpack.c.bf16 %v95_v33, %v87_v32  ;;  %v112_v40 = vld [vmem:[#allocation5 + $0x1d8] sm:$0xff]  ;;  %v101_v41 = vld [vmem:[#allocation5 + $0x180] sm:$0xff] }
  0x40   :  { %780 = vmatpush1.bf16.msra.mxu1 %v779_v25  ;;  %718 = vmatprep.subr.bf16.mxu0 %v717_v26  ;;  %v721_v39 = vpack.c.bf16 %v110_v36, %v102_v35  ;;  %v109_v42 = vld [vmem:[#allocation5 + $0x1c0] sm:$0xff]  ;;  %v785_v43 = vpack.c.bf16 %v112_v40, %v104_v37  ;;  %v103_v44 = vld [vmem:[#allocation5 + $0x190] sm:$0xff]  ;;  %v118_v46 = vld [vmem:[#allocation5 + $0x208] sm:$0xff] }
  0x41   :  { %782 = vmatprep.subr.bf16.mxu1 %v781_v30  ;;  %v111_v45 = vld [vmem:[#allocation5 + $0x1d0] sm:$0xff]  ;;  %v126_v47 = vld [vmem:[#allocation5 + $0x248] sm:$0xff]  ;;  %v120_v48 = vld [vmem:[#allocation5 + $0x218] sm:$0xff]  ;;  %v723_v50 = vpack.c.bf16 %v109_v42, %v101_v41 }
  0x42   :  { %v128_v49 = vld [vmem:[#allocation5 + $0x258] sm:$0xff]  ;;  %v787_v51 = vpack.c.bf16 %v111_v45, %v103_v44  ;;  %v725_v52 = vpack.c.bf16 %v126_v47, %v118_v46  ;;  %v117_v53 = vld [vmem:[#allocation5 + $0x200] sm:$0xff]  ;;  %v119_v55 = vld [vmem:[#allocation5 + $0x210] sm:$0xff] }
  0x43   :  { %720 = vmatpush1.bf16.msra.mxu0 %v719_v34  ;;  %v125_v54 = vld [vmem:[#allocation5 + $0x240] sm:$0xff]  ;;  %v789_v56 = vpack.c.bf16 %v128_v49, %v120_v48  ;;  %v127_v57 = vld [vmem:[#allocation5 + $0x250] sm:$0xff]  ;;  %v134_v58 = vld [vmem:[#allocation5 + $0x288] sm:$0xff] }
  0x44   :  { %784 = vmatpush1.bf16.msra.mxu1 %v783_v38  ;;  %722 = vmatprep.subr.bf16.mxu0 %v721_v39  ;;  %v142_v59 = vld [vmem:[#allocation5 + $0x2c8] sm:$0xff]  ;;  %v136_v60 = vld [vmem:[#allocation5 + $0x298] sm:$0xff]  ;;  %v727_v62 = vpack.c.bf16 %v125_v54, %v117_v53  ;;  %v791_v63 = vpack.c.bf16 %v127_v57, %v119_v55  ;;  %v133_v1 = vld [vmem:[#allocation5 + $0x280] sm:$0xff] }
  0x45   :  { %786 = vmatprep.subr.bf16.mxu1 %v785_v43  ;;  %v144_v61 = vld [vmem:[#allocation5 + $0x2d8] sm:$0xff]  ;;  %v729_v0 = vpack.c.bf16 %v142_v59, %v134_v58  ;;  %v141_v2 = vld [vmem:[#allocation5 + $0x2c0] sm:$0xff]  ;;  %v135_v3 = vld [vmem:[#allocation5 + $0x290] sm:$0xff] }
  0x46   :  { %v793_v4 = vpack.c.bf16 %v144_v61, %v136_v60  ;;  %v143_v5 = vld [vmem:[#allocation5 + $0x2d0] sm:$0xff]  ;;  %v150_v6 = vld [vmem:[#allocation5 + $0x308] sm:$0xff]  ;;  %v152_v8 = vld [vmem:[#allocation5 + $0x318] sm:$0xff]  ;;  %v731_v10 = vpack.c.bf16 %v141_v2, %v133_v1 }
  0x47   :  { %724 = vmatpush1.bf16.msra.mxu0 %v723_v50  ;;  %v158_v7 = vld [vmem:[#allocation5 + $0x348] sm:$0xff]  ;;  %v160_v9 = vld [vmem:[#allocation5 + $0x358] sm:$0xff]  ;;  %v795_v11 = vpack.c.bf16 %v143_v5, %v135_v3  ;;  %v149_v13 = vld [vmem:[#allocation5 + $0x300] sm:$0xff] }
  0x48   :  { %788 = vmatpush1.bf16.msra.mxu1 %v787_v51  ;;  %726 = vmatprep.subr.bf16.mxu0 %v725_v52  ;;  %v733_v12 = vpack.c.bf16 %v158_v7, %v150_v6  ;;  %v157_v14 = vld [vmem:[#allocation5 + $0x340] sm:$0xff]  ;;  %v151_v15 = vld [vmem:[#allocation5 + $0x310] sm:$0xff]  ;;  %v797_v16 = vpack.c.bf16 %v160_v9, %v152_v8  ;;  %v166_v18 = vld [vmem:[#allocation5 + $0x388] sm:$0xff] }
  0x49   :  { %790 = vmatprep.subr.bf16.mxu1 %v789_v56  ;;  %v159_v17 = vld [vmem:[#allocation5 + $0x350] sm:$0xff]  ;;  %v174_v19 = vld [vmem:[#allocation5 + $0x3c8] sm:$0xff]  ;;  %v168_v20 = vld [vmem:[#allocation5 + $0x398] sm:$0xff]  ;;  %v735_v22 = vpack.c.bf16 %v157_v14, %v149_v13 }
  0x4a   :  { %v176_v21 = vld [vmem:[#allocation5 + $0x3d8] sm:$0xff]  ;;  %v799_v23 = vpack.c.bf16 %v159_v17, %v151_v15  ;;  %v737_v24 = vpack.c.bf16 %v174_v19, %v166_v18  ;;  %v165_v25 = vld [vmem:[#allocation5 + $0x380] sm:$0xff]  ;;  %v167_v27 = vld [vmem:[#allocation5 + $0x390] sm:$0xff] }
  0x4b   :  { %728 = vmatpush1.bf16.msra.mxu0 %v727_v62  ;;  %v173_v26 = vld [vmem:[#allocation5 + $0x3c0] sm:$0xff]  ;;  %v801_v28 = vpack.c.bf16 %v176_v21, %v168_v20  ;;  %v175_v29 = vld [vmem:[#allocation5 + $0x3d0] sm:$0xff]  ;;  %v182_v30 = vld [vmem:[#allocation5 + $0x408] sm:$0xff] }
  0x4c   :  { %792 = vmatpush1.bf16.msra.mxu1 %v791_v63  ;;  %730 = vmatprep.subr.bf16.mxu0 %v729_v0  ;;  %v190_v31 = vld [vmem:[#allocation5 + $0x448] sm:$0xff]  ;;  %v184_v32 = vld [vmem:[#allocation5 + $0x418] sm:$0xff]  ;;  %v739_v34 = vpack.c.bf16 %v173_v26, %v165_v25  ;;  %v803_v35 = vpack.c.bf16 %v175_v29, %v167_v27  ;;  %v181_v37 = vld [vmem:[#allocation5 + $0x400] sm:$0xff] }
  0x4d   :  { %794 = vmatprep.subr.bf16.mxu1 %v793_v4  ;;  %v192_v33 = vld [vmem:[#allocation5 + $0x458] sm:$0xff]  ;;  %v741_v36 = vpack.c.bf16 %v190_v31, %v182_v30  ;;  %v189_v38 = vld [vmem:[#allocation5 + $0x440] sm:$0xff]  ;;  %v183_v39 = vld [vmem:[#allocation5 + $0x410] sm:$0xff] }
  0x4e   :  { %v805_v40 = vpack.c.bf16 %v192_v33, %v184_v32  ;;  %v191_v41 = vld [vmem:[#allocation5 + $0x450] sm:$0xff]  ;;  %v198_v42 = vld [vmem:[#allocation5 + $0x488] sm:$0xff]  ;;  %v200_v44 = vld [vmem:[#allocation5 + $0x498] sm:$0xff]  ;;  %v743_v46 = vpack.c.bf16 %v189_v38, %v181_v37 }
  0x4f   :  { %732 = vmatpush1.bf16.msra.mxu0 %v731_v10  ;;  %v206_v43 = vld [vmem:[#allocation5 + $0x4c8] sm:$0xff]  ;;  %v208_v45 = vld [vmem:[#allocation5 + $0x4d8] sm:$0xff]  ;;  %v807_v47 = vpack.c.bf16 %v191_v41, %v183_v39  ;;  %v197_v49 = vld [vmem:[#allocation5 + $0x480] sm:$0xff] }
  0x50   :  { %796 = vmatpush1.bf16.msra.mxu1 %v795_v11  ;;  %734 = vmatprep.subr.bf16.mxu0 %v733_v12  ;;  %v745_v48 = vpack.c.bf16 %v206_v43, %v198_v42  ;;  %v205_v50 = vld [vmem:[#allocation5 + $0x4c0] sm:$0xff]  ;;  %v199_v51 = vld [vmem:[#allocation5 + $0x490] sm:$0xff]  ;;  %v809_v52 = vpack.c.bf16 %v208_v45, %v200_v44  ;;  %v214_v54 = vld [vmem:[#allocation5 + $0x508] sm:$0xff] }
  0x51   :  { %798 = vmatprep.subr.bf16.mxu1 %v797_v16  ;;  %v207_v53 = vld [vmem:[#allocation5 + $0x4d0] sm:$0xff]  ;;  %v222_v55 = vld [vmem:[#allocation5 + $0x548] sm:$0xff]  ;;  %v216_v56 = vld [vmem:[#allocation5 + $0x518] sm:$0xff]  ;;  %v747_v58 = vpack.c.bf16 %v205_v50, %v197_v49 }
  0x52   :  { %v224_v57 = vld [vmem:[#allocation5 + $0x558] sm:$0xff]  ;;  %v811_v59 = vpack.c.bf16 %v207_v53, %v199_v51  ;;  %v749_v60 = vpack.c.bf16 %v222_v55, %v214_v54  ;;  %v213_v61 = vld [vmem:[#allocation5 + $0x500] sm:$0xff]  ;;  %v215_v63 = vld [vmem:[#allocation5 + $0x510] sm:$0xff] }
  0x53   :  { %736 = vmatpush1.bf16.msra.mxu0 %v735_v22  ;;  %v221_v62 = vld [vmem:[#allocation5 + $0x540] sm:$0xff]  ;;  %v813_v0 = vpack.c.bf16 %v224_v57, %v216_v56  ;;  %v223_v1 = vld [vmem:[#allocation5 + $0x550] sm:$0xff]  ;;  %v230_v2 = vld [vmem:[#allocation5 + $0x588] sm:$0xff] }
  0x54   :  { %800 = vmatpush1.bf16.msra.mxu1 %v799_v23  ;;  %738 = vmatprep.subr.bf16.mxu0 %v737_v24  ;;  %v238_v3 = vld [vmem:[#allocation5 + $0x5c8] sm:$0xff]  ;;  %v232_v4 = vld [vmem:[#allocation5 + $0x598] sm:$0xff]  ;;  %v751_v6 = vpack.c.bf16 %v221_v62, %v213_v61  ;;  %v229_v7 = vld [vmem:[#allocation5 + $0x580] sm:$0xff]  ;;  %v815_v8 = vpack.c.bf16 %v223_v1, %v215_v63 }
  0x55   :  { %802 = vmatprep.subr.bf16.mxu1 %v801_v28  ;;  %v240_v5 = vld [vmem:[#allocation5 + $0x5d8] sm:$0xff]  ;;  %v753_v9 = vpack.c.bf16 %v238_v3, %v230_v2  ;;  %v237_v10 = vld [vmem:[#allocation5 + $0x5c0] sm:$0xff]  ;;  %v231_v11 = vld [vmem:[#allocation5 + $0x590] sm:$0xff] }
  0x56   :  { %v239_v12 = vld [vmem:[#allocation5 + $0x5d0] sm:$0xff]  ;;  %v817_v13 = vpack.c.bf16 %v240_v5, %v232_v4  ;;  %v246_v14 = vld [vmem:[#allocation5 + $0x608] sm:$0xff]  ;;  %v1129_v16 = vld.sshfl [vmem:[#allocation2] sm:$0x33 pattern:$0x76325410]  ;;  %v755_v20 = vpack.c.bf16 %v237_v10, %v229_v7 }
  0x57   :  { %740 = vmatpush1.bf16.msra.mxu0 %v739_v34  ;;  %v254_v15 = vld [vmem:[#allocation5 + $0x648] sm:$0xff]  ;;  %v248_v17 = vld [vmem:[#allocation5 + $0x618] sm:$0xff]  ;;  %v1133_v19 = vcombine.high %v1129_v16, %v1129_v16  ;;  %v819_v21 = vpack.c.bf16 %v239_v12, %v231_v11  ;;  %v245_v23 = vld [vmem:[#allocation5 + $0x600] sm:$0xff] }
  0x58   :  { %804 = vmatpush1.bf16.msra.mxu1 %v803_v35  ;;  %742 = vmatprep.subr.bf16.mxu0 %v741_v36  ;;  %v256_v18 = vld [vmem:[#allocation5 + $0x658] sm:$0xff]  ;;  %v757_v22 = vpack.c.bf16 %v254_v15, %v246_v14  ;;  %v253_v24 = vld [vmem:[#allocation5 + $0x640] sm:$0xff]  ;;  %v247_v25 = vld [vmem:[#allocation5 + $0x610] sm:$0xff] }
  0x59   :  { %806 = vmatprep.subr.bf16.mxu1 %v805_v40  ;;  %v821_v26 = vpack.c.bf16 %v256_v18, %v248_v17  ;;  %v255_v27 = vld [vmem:[#allocation5 + $0x650] sm:$0xff]  ;;  %v262_v28 = vld [vmem:[#allocation5 + $0x688] sm:$0xff]  ;;  %426 = vmatprep.mubr.f32.mxu0 %v1133_v19  ;;  %v264_v30 = vld [vmem:[#allocation5 + $0x698] sm:$0xff]  ;;  %v759_v32 = vpack.c.bf16 %v253_v24, %v245_v23 }
  0x5a   :  { %v270_v29 = vld [vmem:[#allocation5 + $0x6c8] sm:$0xff]  ;;  %v272_v31 = vld [vmem:[#allocation5 + $0x6d8] sm:$0xff]  ;;  %497 = vmatprep.mubr.f32.mxu1 %v1133_v19  ;;  %v823_v33 = vpack.c.bf16 %v255_v27, %v247_v25  ;;  %v261_v35 = vld [vmem:[#allocation5 + $0x680] sm:$0xff] }
  0x5b   :  { %744 = vmatpush1.bf16.msra.mxu0 %v743_v46  ;;  %v761_v34 = vpack.c.bf16 %v270_v29, %v262_v28  ;;  %v269_v36 = vld [vmem:[#allocation5 + $0x6c0] sm:$0xff]  ;;  %v263_v37 = vld [vmem:[#allocation5 + $0x690] sm:$0xff]  ;;  %v825_v38 = vpack.c.bf16 %v272_v31, %v264_v30  ;;  %v278_v40 = vld [vmem:[#allocation5 + $0x708] sm:$0xff] }
  0x5c   :  { %808 = vmatpush1.bf16.msra.mxu1 %v807_v47  ;;  %746 = vmatprep.subr.bf16.mxu0 %v745_v48  ;;  %v271_v39 = vld [vmem:[#allocation5 + $0x6d0] sm:$0xff]  ;;  %v286_v41 = vld [vmem:[#allocation5 + $0x748] sm:$0xff]  ;;  %v280_v42 = vld [vmem:[#allocation5 + $0x718] sm:$0xff]  ;;  %v763_v44 = vpack.c.bf16 %v269_v36, %v261_v35 }
  0x5d   :  { %810 = vmatprep.subr.bf16.mxu1 %v809_v52  ;;  %v288_v43 = vld [vmem:[#allocation5 + $0x758] sm:$0xff]  ;;  %v827_v45 = vpack.c.bf16 %v271_v39, %v263_v37  ;;  %v765_v46 = vpack.c.bf16 %v286_v41, %v278_v40  ;;  %v277_v47 = vld [vmem:[#allocation5 + $0x700] sm:$0xff]  ;;  %v279_v49 = vld [vmem:[#allocation5 + $0x710] sm:$0xff] }
  0x5e   :  { %v285_v48 = vld [vmem:[#allocation5 + $0x740] sm:$0xff]  ;;  %v829_v50 = vpack.c.bf16 %v288_v43, %v280_v42  ;;  %v287_v51 = vld [vmem:[#allocation5 + $0x750] sm:$0xff]  ;;  %v294_v52 = vld [vmem:[#allocation5 + $0x788] sm:$0xff] }
  0x5f   :  { %748 = vmatpush1.bf16.msra.mxu0 %v747_v58  ;;  %v302_v53 = vld [vmem:[#allocation5 + $0x7c8] sm:$0xff]  ;;  %v296_v54 = vld [vmem:[#allocation5 + $0x798] sm:$0xff]  ;;  %v767_v56 = vpack.c.bf16 %v285_v48, %v277_v47  ;;  %v831_v57 = vpack.c.bf16 %v287_v51, %v279_v49  ;;  %v295_v61 = vld [vmem:[#allocation5 + $0x790] sm:$0xff] }
  0x60   :  { %812 = vmatpush1.bf16.msra.mxu1 %v811_v59  ;;  %750 = vmatprep.subr.bf16.mxu0 %v749_v60  ;;  %v304_v55 = vld [vmem:[#allocation5 + $0x7d8] sm:$0xff]  ;;  %v769_v58 = vpack.c.bf16 %v302_v53, %v294_v52  ;;  %v293_v59 = vld [vmem:[#allocation5 + $0x780] sm:$0xff]  ;;  %v303_v63 = vld [vmem:[#allocation5 + $0x7d0] sm:$0xff] }
  0x61   :  { %814 = vmatprep.subr.bf16.mxu1 %v813_v0  ;;  %v301_v60 = vld [vmem:[#allocation5 + $0x7c0] sm:$0xff]  ;;  %v833_v62 = vpack.c.bf16 %v304_v55, %v296_v54  ;;  %v58_v0 = vld [vmem:[#allocation5 + $0x28] sm:$0xff]  ;;  %v60_v2 = vld [vmem:[#allocation5 + $0x38] sm:$0xff]  ;;  %v835_v5 = vpack.c.bf16 %v303_v63, %v295_v61 }
  0x62   :  { %v66_v1 = vld [vmem:[#allocation5 + $0x68] sm:$0xff]  ;;  %v68_v3 = vld [vmem:[#allocation5 + $0x78] sm:$0xff]  ;;  %v771_v4 = vpack.c.bf16 %v301_v60, %v293_v59  ;;  %v57_v7 = vld [vmem:[#allocation5 + $0x20] sm:$0xff] }
  0x63   :  { %752 = vmatpush1.bf16.msra.mxu0 %v751_v6  ;;  %v837_v6 = vpack.c.bf16 %v66_v1, %v58_v0  ;;  %v901_v10 = vpack.c.bf16 %v68_v3, %v60_v2  ;;  %v67_v11 = vld [vmem:[#allocation5 + $0x70] sm:$0xff]  ;;  %v74_v12 = vld [vmem:[#allocation5 + $0xa8] sm:$0xff]  ;;  %v76_v14 = vld [vmem:[#allocation5 + $0xb8] sm:$0xff] }
  0x64   :  { %816 = vmatpush1.bf16.msra.mxu1 %v815_v8  ;;  %754 = vmatprep.subr.bf16.mxu0 %v753_v9  ;;  %v65_v8 = vld [vmem:[#allocation5 + $0x60] sm:$0xff]  ;;  %v59_v9 = vld [vmem:[#allocation5 + $0x30] sm:$0xff]  ;;  %v84_v15 = vld [vmem:[#allocation5 + $0xf8] sm:$0xff] }
  0x65   :  { %818 = vmatprep.subr.bf16.mxu1 %v817_v13  ;;  %v82_v13 = vld [vmem:[#allocation5 + $0xe8] sm:$0xff]  ;;  %v839_v17 = vpack.c.bf16 %v65_v8, %v57_v7  ;;  %v903_v18 = vpack.c.bf16 %v67_v11, %v59_v9  ;;  %v75_v23 = vld [vmem:[#allocation5 + $0xb0] sm:$0xff]  ;;  %v905_v24 = vpack.c.bf16 %v84_v15, %v76_v14  ;;  %v92_v28 = vld [vmem:[#allocation5 + $0x138] sm:$0xff] }
  0x66   :  { %v83_v25 = vld [vmem:[#allocation5 + $0xf0] sm:$0xff]  ;;  %v98_v27 = vld [vmem:[#allocation5 + $0x168] sm:$0xff]  ;;  %v100_v29 = vld [vmem:[#allocation5 + $0x178] sm:$0xff] }
  0x67   :  { %756 = vmatpush1.bf16.msra.mxu0 %v755_v20  ;;  %v841_v20 = vpack.c.bf16 %v82_v13, %v74_v12  ;;  %v907_v31 = vpack.c.bf16 %v83_v25, %v75_v23  ;;  %v91_v35 = vld [vmem:[#allocation5 + $0x130] sm:$0xff]  ;;  %v909_v36 = vpack.c.bf16 %v100_v29, %v92_v28  ;;  %v114_v39 = vld [vmem:[#allocation5 + $0x1e8] sm:$0xff]  ;;  %v108_v40 = vld [vmem:[#allocation5 + $0x1b8] sm:$0xff] }
  0x68   :  { %820 = vmatpush1.bf16.msra.mxu1 %v819_v21  ;;  %758 = vmatprep.subr.bf16.mxu0 %v757_v22  ;;  %v73_v21 = vld [vmem:[#allocation5 + $0xa0] sm:$0xff]  ;;  %v99_v37 = vld [vmem:[#allocation5 + $0x170] sm:$0xff]  ;;  %v116_v41 = vld [vmem:[#allocation5 + $0x1f8] sm:$0xff] }
  0x69   :  { %822 = vmatprep.subr.bf16.mxu1 %v821_v26  ;;  %v81_v22 = vld [vmem:[#allocation5 + $0xe0] sm:$0xff]  ;;  %v90_v26 = vld [vmem:[#allocation5 + $0x128] sm:$0xff]  ;;  %v911_v43 = vpack.c.bf16 %v99_v37, %v91_v35  ;;  %v107_v47 = vld [vmem:[#allocation5 + $0x1b0] sm:$0xff]  ;;  %v913_v48 = vpack.c.bf16 %v116_v41, %v108_v40 }
  0x6a   :  { %v843_v30 = vpack.c.bf16 %v81_v22, %v73_v21  ;;  %v115_v49 = vld [vmem:[#allocation5 + $0x1f0] sm:$0xff]  ;;  %v130_v51 = vld [vmem:[#allocation5 + $0x268] sm:$0xff]  ;;  %v124_v52 = vld [vmem:[#allocation5 + $0x238] sm:$0xff] }
  0x6b   :  { %760 = vmatpush1.bf16.msra.mxu0 %v759_v32  ;;  %v845_v32 = vpack.c.bf16 %v98_v27, %v90_v26  ;;  %v132_v53 = vld [vmem:[#allocation5 + $0x278] sm:$0xff]  ;;  %v131_v60 = vld [vmem:[#allocation5 + $0x270] sm:$0xff]  ;;  %v138_v61 = vld [vmem:[#allocation5 + $0x2a8] sm:$0xff] }
  0x6c   :  { %824 = vmatpush1.bf16.msra.mxu1 %v823_v33  ;;  %762 = vmatprep.subr.bf16.mxu0 %v761_v34  ;;  %v89_v33 = vld [vmem:[#allocation5 + $0x120] sm:$0xff]  ;;  %v917_v59 = vpack.c.bf16 %v132_v53, %v124_v52  ;;  %v140_v63 = vld [vmem:[#allocation5 + $0x2b8] sm:$0xff]  ;;  %v147_v8 = vld [vmem:[#allocation5 + $0x2f0] sm:$0xff] }
  0x6d   :  { %826 = vmatprep.subr.bf16.mxu1 %v825_v38  ;;  %v97_v34 = vld [vmem:[#allocation5 + $0x160] sm:$0xff]  ;;  %v106_v38 = vld [vmem:[#allocation5 + $0x1a8] sm:$0xff]  ;;  %v148_v0 = vld [vmem:[#allocation5 + $0x2f8] sm:$0xff] }
  0x6e   :  { %v847_v42 = vpack.c.bf16 %v97_v34, %v89_v33  ;;  %v921_v7 = vpack.c.bf16 %v148_v0, %v140_v63  ;;  %v154_v9 = vld [vmem:[#allocation5 + $0x328] sm:$0xff]  ;;  %v156_v11 = vld [vmem:[#allocation5 + $0x338] sm:$0xff]  ;;  %v163_v22 = vld [vmem:[#allocation5 + $0x370] sm:$0xff] }
  0x6f   :  { %764 = vmatpush1.bf16.msra.mxu0 %v763_v44  ;;  %v849_v44 = vpack.c.bf16 %v114_v39, %v106_v38  ;;  %v164_v12 = vld [vmem:[#allocation5 + $0x378] sm:$0xff]  ;;  %v170_v23 = vld [vmem:[#allocation5 + $0x3a8] sm:$0xff]  ;;  %v179_v34 = vld [vmem:[#allocation5 + $0x3f0] sm:$0xff] }
  0x70   :  { %828 = vmatpush1.bf16.msra.mxu1 %v827_v45  ;;  %766 = vmatprep.subr.bf16.mxu0 %v765_v46  ;;  %v105_v45 = vld [vmem:[#allocation5 + $0x1a0] sm:$0xff]  ;;  %v925_v21 = vpack.c.bf16 %v164_v12, %v156_v11  ;;  %v172_v25 = vld [vmem:[#allocation5 + $0x3b8] sm:$0xff]  ;;  %v186_v35 = vld [vmem:[#allocation5 + $0x428] sm:$0xff] }
  0x71   :  { %830 = vmatprep.subr.bf16.mxu1 %v829_v50  ;;  %v113_v46 = vld [vmem:[#allocation5 + $0x1e0] sm:$0xff]  ;;  %v122_v50 = vld [vmem:[#allocation5 + $0x228] sm:$0xff]  ;;  %v180_v26 = vld [vmem:[#allocation5 + $0x3f8] sm:$0xff] }
  0x72   :  { %v851_v54 = vpack.c.bf16 %v113_v46, %v105_v45  ;;  %v853_v55 = vpack.c.bf16 %v130_v51, %v122_v50  ;;  %v929_v33 = vpack.c.bf16 %v180_v26, %v172_v25  ;;  %v188_v37 = vld [vmem:[#allocation5 + $0x438] sm:$0xff]  ;;  %v195_v46 = vld [vmem:[#allocation5 + $0x470] sm:$0xff] }
  0x73   :  { %768 = vmatpush1.bf16.msra.mxu0 %v767_v56  ;;  %v121_v56 = vld [vmem:[#allocation5 + $0x220] sm:$0xff]  ;;  %v196_v38 = vld [vmem:[#allocation5 + $0x478] sm:$0xff] }
  0x74   :  { %832 = vmatpush1.bf16.msra.mxu1 %v831_v57  ;;  %770 = vmatprep.subr.bf16.mxu0 %v769_v58  ;;  %v129_v57 = vld [vmem:[#allocation5 + $0x260] sm:$0xff]  ;;  %v123_v58 = vld [vmem:[#allocation5 + $0x230] sm:$0xff]  ;;  %v933_v45 = vpack.c.bf16 %v196_v38, %v188_v37  ;;  %v212_v50 = vld [vmem:[#allocation5 + $0x4f8] sm:$0xff] }
  0x75   :  { %834 = vmatprep.subr.bf16.mxu1 %v833_v62  ;;  %v146_v62 = vld [vmem:[#allocation5 + $0x2e8] sm:$0xff]  ;;  %v855_v1 = vpack.c.bf16 %v129_v57, %v121_v56  ;;  %v919_v2 = vpack.c.bf16 %v131_v60, %v123_v58  ;;  %v211_v57 = vld [vmem:[#allocation5 + $0x4f0] sm:$0xff]  ;;  %v220_v60 = vld [vmem:[#allocation5 + $0x538] sm:$0xff] }
  0x76   :  { %v857_v3 = vpack.c.bf16 %v146_v62, %v138_v61  ;;  %v218_v58 = vld [vmem:[#allocation5 + $0x528] sm:$0xff]  ;;  %v228_v61 = vld [vmem:[#allocation5 + $0x578] sm:$0xff] }
  0x77   :  { %772 = vmatpush1.bf16.msra.mxu0 %v771_v4  ;;  %v137_v4 = vld [vmem:[#allocation5 + $0x2a0] sm:$0xff] }
  0x78   :  { %836 = vmatpush1.bf16.msra.mxu1 %v835_v5  ;;  %838 = vmatprep.subr.bf16.mxu0 %v837_v6  ;;  %v145_v5 = vld [vmem:[#allocation5 + $0x2e0] sm:$0xff]  ;;  %v139_v6 = vld [vmem:[#allocation5 + $0x2b0] sm:$0xff] }
  0x79   :  { %902 = vmatprep.subr.bf16.mxu1 %v901_v10  ;;  %v162_v10 = vld [vmem:[#allocation5 + $0x368] sm:$0xff]  ;;  %v859_v13 = vpack.c.bf16 %v145_v5, %v137_v4  ;;  %v923_v14 = vpack.c.bf16 %v147_v8, %v139_v6  ;;  %v941_v4 = vpack.c.bf16 %v228_v61, %v220_v60  ;;  %v227_v5 = vld [vmem:[#allocation5 + $0x570] sm:$0xff]  ;;  %v236_v8 = vld [vmem:[#allocation5 + $0x5b8] sm:$0xff] }
  0x7a   :  { %427 = vmatmul.mubr.f32.vlgmr.msra.gmra.mrb[0].mxu0 %v1129_v16  ;;  %v861_v15 = vpack.c.bf16 %v162_v10, %v154_v9  ;;  %v234_v6 = vld [vmem:[#allocation5 + $0x5a8] sm:$0xff]  ;;  %v244_v9 = vld [vmem:[#allocation5 + $0x5f8] sm:$0xff] }
  0x7b   :  { %498 = vmatmul.mubr.f32.vlgmr.msra.gmra.mrb[0].mxu1 %v1129_v16  ;;  %840 = vmatpush1.bf16.msra.mxu0 %v839_v17  ;;  %v153_v17 = vld [vmem:[#allocation5 + $0x320] sm:$0xff] }
  0x7c   :  { %904 = vmatpush1.bf16.msra.mxu1 %v903_v18  ;;  %842 = vmatprep.subr.bf16.mxu0 %v841_v20  ;;  %v161_v18 = vld [vmem:[#allocation5 + $0x360] sm:$0xff]  ;;  %v155_v20 = vld [vmem:[#allocation5 + $0x330] sm:$0xff] }
  0x7d   :  { %906 = vmatprep.subr.bf16.mxu1 %v905_v24  ;;  %568 = vmatprep.mubr.f32.mxu0 %v1133_v19  ;;  %v178_v24 = vld [vmem:[#allocation5 + $0x3e8] sm:$0xff]  ;;  %v863_v27 = vpack.c.bf16 %v161_v18, %v153_v17  ;;  %v927_v28 = vpack.c.bf16 %v163_v22, %v155_v20  ;;  %v945_v17 = vpack.c.bf16 %v244_v9, %v236_v8  ;;  %v243_v18 = vld [vmem:[#allocation5 + $0x5f0] sm:$0xff]  ;;  %v252_v22 = vld [vmem:[#allocation5 + $0x638] sm:$0xff] }
  0x7e   :  { %639 = vmatprep.mubr.f32.mxu1 %v1133_v19  ;;  %v915_v19 = vpack.c.bf16 %v115_v49, %v107_v47  ;;  %v865_v29 = vpack.c.bf16 %v178_v24, %v170_v23  ;;  %v202_v47 = vld [vmem:[#allocation5 + $0x4a8] sm:$0xff]  ;;  %v204_v49 = vld [vmem:[#allocation5 + $0x4b8] sm:$0xff]  ;;  %v309_v8 = vld [vmem:[#allocation7] sm:$0xff] }
  0x7f   :  { %844 = vmatpush1.bf16.msra.mxu0 %v843_v30  ;;  %v169_v30 = vld [vmem:[#allocation5 + $0x3a0] sm:$0xff]  ;;  %v937_v56 = vpack.c.bf16 %v212_v50, %v204_v49  ;;  %v250_v20 = vld [vmem:[#allocation5 + $0x628] sm:$0xff]  ;;  %v260_v23 = vld [vmem:[#allocation5 + $0x678] sm:$0xff] }
  0x80   :  { %908 = vmatpush1.bf16.msra.mxu1 %v907_v31  ;;  %846 = vmatprep.subr.bf16.mxu0 %v845_v32  ;;  %v177_v31 = vld [vmem:[#allocation5 + $0x3e0] sm:$0xff]  ;;  %v171_v32 = vld [vmem:[#allocation5 + $0x3b0] sm:$0xff] }
  0x81   :  { %910 = vmatprep.subr.bf16.mxu1 %v909_v36  ;;  %v194_v36 = vld [vmem:[#allocation5 + $0x468] sm:$0xff]  ;;  %v867_v39 = vpack.c.bf16 %v177_v31, %v169_v30  ;;  %v931_v40 = vpack.c.bf16 %v179_v34, %v171_v32  ;;  %v949_v30 = vpack.c.bf16 %v260_v23, %v252_v22  ;;  %v259_v31 = vld [vmem:[#allocation5 + $0x670] sm:$0xff]  ;;  %v268_v34 = vld [vmem:[#allocation5 + $0x6b8] sm:$0xff] }
  0x82   :  { %v869_v41 = vpack.c.bf16 %v194_v36, %v186_v35  ;;  %v266_v32 = vld [vmem:[#allocation5 + $0x6a8] sm:$0xff]  ;;  %v276_v35 = vld [vmem:[#allocation5 + $0x6f8] sm:$0xff] }
  0x83   :  { %848 = vmatpush1.bf16.msra.mxu0 %v847_v42  ;;  %v185_v42 = vld [vmem:[#allocation5 + $0x420] sm:$0xff] }
  0x84   :  { %912 = vmatpush1.bf16.msra.mxu1 %v911_v43  ;;  %850 = vmatprep.subr.bf16.mxu0 %v849_v44  ;;  %v193_v43 = vld [vmem:[#allocation5 + $0x460] sm:$0xff]  ;;  %v187_v44 = vld [vmem:[#allocation5 + $0x430] sm:$0xff] }
  0x85   :  { %914 = vmatprep.subr.bf16.mxu1 %v913_v48  ;;  %v210_v48 = vld [vmem:[#allocation5 + $0x4e8] sm:$0xff]  ;;  %v871_v51 = vpack.c.bf16 %v193_v43, %v185_v42  ;;  %v935_v52 = vpack.c.bf16 %v195_v46, %v187_v44  ;;  %v953_v42 = vpack.c.bf16 %v276_v35, %v268_v34  ;;  %v275_v43 = vld [vmem:[#allocation5 + $0x6f0] sm:$0xff]  ;;  %v284_v46 = vld [vmem:[#allocation5 + $0x738] sm:$0xff] }
  0x86   :  { %v873_v53 = vpack.c.bf16 %v210_v48, %v202_v47  ;;  %v282_v44 = vld [vmem:[#allocation5 + $0x728] sm:$0xff]  ;;  %v292_v47 = vld [vmem:[#allocation5 + $0x778] sm:$0xff] }
  0x87   :  { %852 = vmatpush1.bf16.msra.mxu0 %v851_v54  ;;  %v201_v54 = vld [vmem:[#allocation5 + $0x4a0] sm:$0xff] }
  0x88   :  { %916 = vmatpush1.bf16.msra.mxu1 %v915_v19  ;;  %854 = vmatprep.subr.bf16.mxu0 %v853_v55  ;;  %v209_v19 = vld [vmem:[#allocation5 + $0x4e0] sm:$0xff]  ;;  %v203_v55 = vld [vmem:[#allocation5 + $0x4b0] sm:$0xff] }
  0x89   :  { %918 = vmatprep.subr.bf16.mxu1 %v917_v59  ;;  %v226_v59 = vld [vmem:[#allocation5 + $0x568] sm:$0xff]  ;;  %v875_v62 = vpack.c.bf16 %v209_v19, %v201_v54  ;;  %v939_v63 = vpack.c.bf16 %v211_v57, %v203_v55  ;;  %v957_v54 = vpack.c.bf16 %v292_v47, %v284_v46  ;;  %v291_v19 = vld [vmem:[#allocation5 + $0x770] sm:$0xff]  ;;  %v300_v57 = vld [vmem:[#allocation5 + $0x7b8] sm:$0xff] }
  0x8a   :  { %v877_v0 = vpack.c.bf16 %v226_v59, %v218_v58  ;;  %v298_v55 = vld [vmem:[#allocation5 + $0x7a8] sm:$0xff]  ;;  %v308_v58 = vld [vmem:[#allocation5 + $0x7f8] sm:$0xff] }
  0x8b   :  { %856 = vmatpush1.bf16.msra.mxu0 %v855_v1  ;;  %v217_v1 = vld [vmem:[#allocation5 + $0x520] sm:$0xff] }
  0x8c   :  { %920 = vmatpush1.bf16.msra.mxu1 %v919_v2  ;;  %858 = vmatprep.subr.bf16.mxu0 %v857_v3  ;;  %v225_v2 = vld [vmem:[#allocation5 + $0x560] sm:$0xff]  ;;  %v219_v3 = vld [vmem:[#allocation5 + $0x530] sm:$0xff] }
  0x8d   :  { %922 = vmatprep.subr.bf16.mxu1 %v921_v7  ;;  %v242_v7 = vld [vmem:[#allocation5 + $0x5e8] sm:$0xff]  ;;  %v879_v10 = vpack.c.bf16 %v225_v2, %v217_v1  ;;  %v943_v11 = vpack.c.bf16 %v227_v5, %v219_v3  ;;  %v299_v1 = vld [vmem:[#allocation5 + $0x7b0] sm:$0xff]  ;;  %v311_v5 = vlaneseq }
  0x8e   :  { %v881_v12 = vpack.c.bf16 %v242_v7, %v234_v6  ;;  %v307_v2 = vld [vmem:[#allocation5 + $0x7f0] sm:$0xff] }
  0x8f   :  { %860 = vmatpush1.bf16.msra.mxu0 %v859_v13  ;;  %v233_v13 = vld [vmem:[#allocation5 + $0x5a0] sm:$0xff]  ;;  %v312_v6 = vshrl.u32 %v311_v5, 7 }
  0x90   :  { %924 = vmatpush1.bf16.msra.mxu1 %v923_v14  ;;  %862 = vmatprep.subr.bf16.mxu0 %v861_v15  ;;  %v241_v14 = vld [vmem:[#allocation5 + $0x5e0] sm:$0xff]  ;;  %v235_v15 = vld [vmem:[#allocation5 + $0x5b0] sm:$0xff] }
  0x91   :  { %926 = vmatprep.subr.bf16.mxu1 %v925_v21  ;;  %v258_v21 = vld [vmem:[#allocation5 + $0x668] sm:$0xff]  ;;  %v883_v24 = vpack.c.bf16 %v241_v14, %v233_v13  ;;  %v947_v25 = vpack.c.bf16 %v243_v18, %v235_v15  ;;  %v329_v7 = vsub.s32 4, %v312_v6  ;;  %v321_v18 = vsub.s32 2, %v312_v6 }
  0x92   :  { %v885_v26 = vpack.c.bf16 %v258_v21, %v250_v20  ;;  %v317_v20 = vsub.s32 1, %v312_v6  ;;  %v1071_v21 = vmov 1983009808   ;;  %v325_v23 = vsub.s32 3, %v312_v6 }
  0x93   :  { %864 = vmatpush1.bf16.msra.mxu0 %v863_v27  ;;  %v249_v27 = vld [vmem:[#allocation5 + $0x620] sm:$0xff]  ;;  %v330_v9 = vrot.slane %v309_v8, %v329_v7  ;;  %v657_v22 = vunpack.c.l.s4 %v1071_v21 }
  0x94   :  { %928 = vmatpush1.bf16.msra.mxu1 %v927_v28  ;;  %866 = vmatprep.subr.bf16.mxu0 %v865_v29  ;;  %v257_v28 = vld [vmem:[#allocation5 + $0x660] sm:$0xff]  ;;  %v251_v29 = vld [vmem:[#allocation5 + $0x630] sm:$0xff] }
  0x95   :  { %930 = vmatprep.subr.bf16.mxu1 %v929_v33  ;;  %v274_v33 = vld [vmem:[#allocation5 + $0x6e8] sm:$0xff]  ;;  %v887_v36 = vpack.c.bf16 %v257_v28, %v249_v27  ;;  %v951_v37 = vpack.c.bf16 %v259_v31, %v251_v29  ;;  %v326_v27 = vrot.slane %v309_v8, %v325_v23 }
  0x96   :  { %v889_v38 = vpack.c.bf16 %v274_v33, %v266_v32 }
  0x97   :  { %868 = vmatpush1.bf16.msra.mxu0 %v867_v39  ;;  %v265_v39 = vld [vmem:[#allocation5 + $0x6a0] sm:$0xff] }
  0x98   :  { %932 = vmatpush1.bf16.msra.mxu1 %v931_v40  ;;  %870 = vmatprep.subr.bf16.mxu0 %v869_v41  ;;  %v273_v40 = vld [vmem:[#allocation5 + $0x6e0] sm:$0xff]  ;;  %v267_v41 = vld [vmem:[#allocation5 + $0x6b0] sm:$0xff] }
  0x99   :  { %934 = vmatprep.subr.bf16.mxu1 %v933_v45  ;;  %v290_v45 = vld [vmem:[#allocation5 + $0x768] sm:$0xff]  ;;  %v891_v48 = vpack.c.bf16 %v273_v40, %v265_v39  ;;  %v955_v49 = vpack.c.bf16 %v275_v43, %v267_v41 }
  0x9a   :  { %v893_v50 = vpack.c.bf16 %v290_v45, %v282_v44 }
  0x9b   :  { %872 = vmatpush1.bf16.msra.mxu0 %v871_v51  ;;  %v281_v51 = vld [vmem:[#allocation5 + $0x720] sm:$0xff] }
  0x9c   :  { %936 = vmatpush1.bf16.msra.mxu1 %v935_v52  ;;  %874 = vmatprep.subr.bf16.mxu0 %v873_v53  ;;  %v289_v52 = vld [vmem:[#allocation5 + $0x760] sm:$0xff]  ;;  %v283_v53 = vld [vmem:[#allocation5 + $0x730] sm:$0xff] }
  0x9d   :  { %938 = vmatprep.subr.bf16.mxu1 %v937_v56  ;;  %v306_v56 = vld [vmem:[#allocation5 + $0x7e8] sm:$0xff]  ;;  %v895_v59 = vpack.c.bf16 %v289_v52, %v281_v51  ;;  %v959_v60 = vpack.c.bf16 %v291_v19, %v283_v53 }
  0x9e   :  { %v897_v61 = vpack.c.bf16 %v306_v56, %v298_v55 }
  0x9f   :  { %876 = vmatpush1.bf16.msra.mxu0 %v875_v62  ;;  %v297_v62 = vld [vmem:[#allocation5 + $0x7a0] sm:$0xff] }
  0xa0   :  { %940 = vmatpush1.bf16.msra.mxu1 %v939_v63  ;;  %878 = vmatprep.subr.bf16.mxu0 %v877_v0  ;;  %v305_v63 = vld [vmem:[#allocation5 + $0x7e0] sm:$0xff]  ;;  %v961_v0 = vpack.c.bf16 %v308_v58, %v300_v57 }
  0xa1   :  { %942 = vmatprep.subr.bf16.mxu1 %v941_v4  ;;  %v899_v3 = vpack.c.bf16 %v305_v63, %v297_v62  ;;  %v963_v4 = vpack.c.bf16 %v307_v2, %v299_v1 }
  0xa3   :  { %880 = vmatpush1.bf16.msra.mxu0 %v879_v10  ;;  %v337_v10 = vsub.s32 6, %v312_v6 }
  0xa4   :  { %944 = vmatpush1.bf16.msra.mxu1 %v943_v11  ;;  %882 = vmatprep.subr.bf16.mxu0 %v881_v12  ;;  %v333_v11 = vsub.s32 5, %v312_v6  ;;  %v341_v12 = vsub.s32 7, %v312_v6 }
  0xa5   :  { %946 = vmatprep.subr.bf16.mxu1 %v945_v17  ;;  %v338_v13 = vrot.slane %v309_v8, %v337_v10  ;;  %v313_v17 = vsub.s32 0, %v312_v6 }
  0xa6   :  { %v334_v14 = vrot.slane %v309_v8, %v333_v11  ;;  %v342_v15 = vrot.slane %v309_v8, %v341_v12 }
  0xa7   :  { %884 = vmatpush1.bf16.msra.mxu0 %v883_v24  ;;  %v314_v24 = vrot.slane %v309_v8, %v313_v17 }
  0xa8   :  { %948 = vmatpush1.bf16.msra.mxu1 %v947_v25  ;;  %886 = vmatprep.subr.bf16.mxu0 %v885_v26  ;;  %v322_v25 = vrot.slane %v309_v8, %v321_v18  ;;  %v658_v26 = vunpack.c.0.s8 %v657_v22 }
  0xa9   :  { %950 = vmatprep.subr.bf16.mxu1 %v949_v30 }
  0xaa   :  { %v661_v34 = vsub.s32 %v658_v26, %v312_v6 }
  0xab   :  { %888 = vmatpush1.bf16.msra.mxu0 %v887_v36 }
  0xac   :  { %952 = vmatpush1.bf16.msra.mxu1 %v951_v37  ;;  %890 = vmatprep.subr.bf16.mxu0 %v889_v38 }
  0xad   :  { %954 = vmatprep.subr.bf16.mxu1 %v953_v42 }
  0xaf   :  { %892 = vmatpush1.bf16.msra.mxu0 %v891_v48 }
  0xb0   :  { %956 = vmatpush1.bf16.msra.mxu1 %v955_v49  ;;  %894 = vmatprep.subr.bf16.mxu0 %v893_v50 }
  0xb1   :  { %958 = vmatprep.subr.bf16.mxu1 %v957_v54 }
  0xb3   :  { %896 = vmatpush1.bf16.msra.mxu0 %v895_v59 }
  0xb4   :  { %960 = vmatpush1.bf16.msra.mxu1 %v959_v60  ;;  %898 = vmatprep.subr.bf16.mxu0 %v897_v61 }
  0xb5   :  { %962 = vmatprep.subr.bf16.mxu1 %v961_v0 }
  0xb7   :  { %900 = vmatpush1.bf16.msra.mxu0 %v899_v3 }
  0xb8   :  { %964 = vmatpush1.bf16.msra.mxu1 %v963_v4 }
  0xba   :  { %569 = vmatmul.mubr.f32.vlgmr.msra.gmra.mrb[2].mxu0 %v1129_v16 }
  0xbb   :  { %640 = vmatmul.mubr.f32.vlgmr.msra.gmra.mrb[2].mxu1 %v1129_v16  ;;  %v318_v16 = vrot.slane %v309_v8, %v317_v20 }
 0x14d   :  { %v428_v28 = vpop.f32.mrb[0].mxu0 }
 0x14e   :  { %v429_v29 = vadd.f32 %v428_v28, %v314_v24  ;;  %v499_v30 = vpop.f32.mrb[0].mxu1  ;;  %v430_v31 = vpop.f32.mrb[1].mxu0 }
 0x14f   :  { %v500_v32 = vadd.f32 %v499_v30, %v322_v25  ;;  %v431_v33 = vadd.f32 %v430_v31, %v318_v16  ;;  %v501_v35 = vpop.f32.mrb[1].mxu1 }
 0x150   :  { %v502_v36 = vadd.f32 %v501_v35, %v326_v27 }
 0x151   :  { %v654_v37 = vcombine.low %v429_v29, %v431_v33 }
 0x152   :  { %v655_v38 = vcombine.low %v500_v32, %v502_v36 }
 0x153   :  { %v662_v39 = vrot.slane %v654_v37, %v661_v34 }
 0x154   :  { %v669_v40 = vrot.slane %v655_v38, %v661_v34 }
 0x156   :  { %v670_v41 = vcombine.low %v662_v39, %v669_v40 }
 0x158   :  { %690 = vst [vmem:[#allocation8] sm:$0xff] %v670_v41 }
 0x18d   :  { %v570_v42 = vpop.f32.mrb[2].mxu0 }
 0x18e   :  { %v571_v43 = vadd.f32 %v570_v42, %v330_v9  ;;  %v641_v44 = vpop.f32.mrb[2].mxu1  ;;  %v572_v45 = vpop.f32.mrb[3].mxu0 }
 0x18f   :  { %v642_v46 = vadd.f32 %v641_v44, %v338_v13  ;;  %v573_v47 = vadd.f32 %v572_v45, %v334_v14  ;;  %v643_v48 = vpop.f32.mrb[3].mxu1 }
 0x190   :  { %v644_v49 = vadd.f32 %v643_v48, %v342_v15 }
 0x191   :  { %v671_v50 = vcombine.low %v571_v43, %v573_v47 }
 0x192   :  { %v672_v51 = vcombine.low %v642_v46, %v644_v49 }
 0x193   :  { %v679_v52 = vrot.slane %v671_v50, %v661_v34 }
 0x194   :  { %v686_v53 = vrot.slane %v672_v51, %v661_v34 }
 0x196   :  { %v687_v54 = vcombine.low %v679_v52, %v686_v53 }
 0x198   :  { %691 = vst [vmem:[#allocation8 + $0x8] sm:$0xff] %v687_v54 }
 0x199   :  { %1049 = shalt.err (!%p1046_p0)
}
 0x19a   :  { %s1050_s25 = scalar_lea.hbm %s1158_s3, 256 }
 0x19b   :  { %p1051_p1 = scmp.ne.s32.totalorder %s1158_s3, %s1050_s25  ;;  %p1054_p2 = scmp.lt.u32.totalorder %s1050_s25, %s1158_s3 }
 0x19d   :  { %p1056_p3 = pnand %p1054_p2, %p1051_p1 }
 0x19f   :  { %1059 = shalt.err (!%p1056_p3)
}
 0x1a0   :  { %701 = dma.vmem_to_hbm [thread:$0]  %s699_s21, 256, %s1158_s3, [#allocation4]  }
 0x1a1   :  { %1064 = dma.done.wait [#allocation4], 256  }
 0x1a2   :  { %1065 = vsyncadd [#allocation4], 4294967040 }
 0x1a3   :  { %705 = vsyncpa [#allocation3], 1 }
 0x1a4   :  { %706 = vsyncpa [#allocation6], 1 }
 0x1a5   :  { %707 = vsyncpa [#allocation4], 1 }

</bundles_post_ra>
